<compile_context>
chip_gen: v5e
topology: v5e:2x2
jax: 0.10.0
libtpu: 0.0.40
codegen_flags: <defaults>
</compile_context>

<pallas_src>
import functools

import jax
import jax.numpy as jnp
from jax.experimental import pallas as pl
from jax.experimental.pallas import tpu as pltpu

_LANES = 128                       # pixels per lane-row of each output slab
_ROW_WIDTH = 3 * _LANES            # 384 interleaved values per input lane-row
_TARGET_BLOCK_BYTES = 3 << 20      # ~3 MiB per input block (Pallas double-buffers)
_VMEM_LIMIT_BYTES = 48 << 20       # leaves headroom on v7x's 64 MiB physical VMEM


def _round_up(x, m):
    return ((x + m - 1) // m) * m


def _round_down(x, m):
    return (x // m) * m


def _permutation_matrix():
    # P[k, c*128 + j] = 1  iff  k == 3*j + c  (k indexes the interleaved row).
    # {0, 1} is exact in bf16, which halves P's footprint/DMA and feeds the
    # single-pass bf16 MXU path directly.
    k = jnp.arange(_ROW_WIDTH, dtype=jnp.int32)[:, None]
    o = jnp.arange(_ROW_WIDTH, dtype=jnp.int32)[None, :]
    src = 3 * (o % _LANES) + (o // _LANES)
    return (k == src).astype(jnp.bfloat16)


def _channel_split_kernel(x_ref, p_ref, y0_ref, y1_ref, y2_ref, *, n_terms):
    p = p_ref[...]                                  # (384, 384) bf16 0/1 matrix
    x = x_ref[...]

    # Exact LHS-only bf16 split: sum(terms) == x with every term exact in bf16,
    # so each DEFAULT-precision bf16 MXU pass against the 0/1 matrix is an
    # exact per-row selection and the f32 accumulation reconstructs x exactly.
    if n_terms == 1:
        terms = [x.astype(jnp.bfloat16)]            # bf16 input: already exact
    else:
        resid = x.astype(jnp.float32)
        terms = []
        for _ in range(n_terms - 1):
            t = resid.astype(jnp.bfloat16)
            terms.append(t)
            resid = resid - t.astype(jnp.float32)
        terms.append(resid.astype(jnp.bfloat16))

    # One N=384 dot per term (best packing on the 256-wide v6e/v7x MXU).
    # TODO(synk): on v5e (128-wide MXU) three per-channel N=128 dots stored
    # straight into y{0,1,2}_ref would skip the (R, 384) intermediate for free.
    y = jnp.dot(terms[0], p, preferred_element_type=jnp.float32)
    for t in terms[1:]:
        y = y + jnp.dot(t, p, preferred_element_type=jnp.float32)
    y = y.astype(y0_ref.dtype)

    # Lane-aligned static slices -> whole-vreg selects + unmasked full stores.
    y0_ref[...] = y[:, 0 * _LANES:1 * _LANES]
    y1_ref[...] = y[:, 1 * _LANES:2 * _LANES]
    y2_ref[...] = y[:, 2 * _LANES:3 * _LANES]


def _choose_block_rows(rows, sublane, itemsize):
    """Rows per grid step: sublane-aligned, ~3 MiB, and >= 2 steps when possible."""
    max_rows = max(
        sublane,
        _round_down(_TARGET_BLOCK_BYTES // (_ROW_WIDTH * itemsize), sublane),
    )
    if rows <= 2 * sublane:
        return rows                                  # tiny input: one full block
    # Prefer >= 2 grid steps so both v7x TensorCores get work ("parallel" axis).
    half = _round_up(pl.cdiv(rows, 2), sublane)
    return min(max_rows, half)


def channel_split(image):
    """image: (B, H, W, 3) -> tuple of three (B, H, W) arrays (exact split)."""
    B, H, W, C = image.shape
    assert C == 3, "ChannelSplit expects 3 channels in the last dim"
    dtype = image.dtype

    # Exact reconstruction needs ceil(significand_bits / 8) bf16 MXU passes;
    # sublane alignment is dtype-aware (8 for f32, 16 for 16-bit dtypes).
    if dtype == jnp.float32:
        n_terms, sublane = 3, 8
    elif dtype == jnp.bfloat16:
        n_terms, sublane = 1, 16
    elif dtype == jnp.float16:
        n_terms, sublane = 2, 16
    else:
        # TODO(synk): integer (uint8/int32) and f64 image dtypes need a
        # dedicated exact path; not implemented here.
        raise NotImplementedError(f"channel_split: unsupported dtype {dtype}")

    itemsize = jnp.dtype(dtype).itemsize
    n_pix = B * H * W

    if n_pix % _LANES == 0:
        rows = n_pix // _LANES
        x2d = image.reshape(rows, _ROW_WIDTH)        # free bitcast reshape
        padded = False
    else:
        # TODO(synk): rare non-128-aligned path keeps one pad/slice copy; the
        # aligned case above is fully zero-copy.
        rows = pl.cdiv(n_pix, _LANES)
        flat = jnp.pad(image.reshape(n_pix, 3),
                       ((0, rows * _LANES - n_pix), (0, 0)))
        x2d = flat.reshape(rows, _ROW_WIDTH)
        padded = True

    block_rows = _choose_block_rows(rows, sublane, itemsize)
    # cdiv grid: a partial last block is fine — its garbage input rows only
    # produce garbage output rows, and OOB output writes are dropped.
    grid = (pl.cdiv(rows, block_rows),)

    perm = _permutation_matrix()

    cost = pl.CostEstimate(
        flops=2 * n_terms * rows * _ROW_WIDTH * _ROW_WIDTH,
        transcendentals=0,
        bytes_accessed=2 * rows * _ROW_WIDTH * itemsize + perm.size * 2,
    )

    out_sds = jax.ShapeDtypeStruct((rows, _LANES), dtype)
    kernel = functools.partial(_channel_split_kernel, n_terms=n_terms)

    y0, y1, y2 = pl.pallas_call(
        kernel,
        out_shape=(out_sds, out_sds, out_sds),
        grid_spec=pltpu.PrefetchScalarGridSpec(
            num_scalar_prefetch=0,
            grid=grid,
            in_specs=[
                pl.BlockSpec((block_rows, _ROW_WIDTH), lambda i: (i, 0)),
                # Constant block: P stays VMEM-resident across the whole grid.
                pl.BlockSpec((_ROW_WIDTH, _ROW_WIDTH), lambda i: (0, 0)),
            ],
            out_specs=[
                pl.BlockSpec((block_rows, _LANES), lambda i: (i, 0))
                for _ in range(3)
            ],
        ),
        compiler_params=pltpu.CompilerParams(
            dimension_semantics=("parallel",),
            vmem_limit_bytes=_VMEM_LIMIT_BYTES,
        ),
        cost_estimate=cost,
    )(x2d, perm)

    if padded:
        def _unflatten(y):
            return y.reshape(-1)[:n_pix].reshape(B, H, W)
    else:
        def _unflatten(y):
            return y.reshape(B, H, W)

    return _unflatten(y0), _unflatten(y1), _unflatten(y2)


if __name__ == "__main__":
    key = jax.random.PRNGKey(0)
    B, H, W, C = 2, 16, 16, 3
    image = jax.random.normal(key, (B, H, W, C), dtype=jnp.float32)

    y0, y1, y2 = channel_split(image)
    jax.block_until_ready((y0, y1, y2))

    ref0, ref1, ref2 = image[..., 0], image[..., 1], image[..., 2]
    assert y0.shape == (B, H, W) and y1.shape == (B, H, W) and y2.shape == (B, H, W)
    assert jnp.array_equal(y0, ref0)
    assert jnp.array_equal(y1, ref1)
    assert jnp.array_equal(y2, ref2)

    print("KERNEL_OK")
</pallas_src>

<mosaic_0001>
module attributes {stable_mosaic.version = 11 : i64} {
  func.func @_channel_split_kernel(%arg0: i32, %arg1: memref<4x384xf32, #tpu.memory_space<vmem>>, %arg2: memref<384x384xbf16, #tpu.memory_space<vmem>>, %arg3: memref<4x128xf32, #tpu.memory_space<vmem>>, %arg4: memref<4x128xf32, #tpu.memory_space<vmem>>, %arg5: memref<4x128xf32, #tpu.memory_space<vmem>>) attributes {dimension_semantics = [#tpu.dimension_semantics<parallel>], iteration_bounds = array<i64: 1>, scalar_prefetch = 0 : i64, scratch_operands = 0 : i64, tpu.core_type = #tpu.core_type<tc>, window_params = [{transform_indices = @transform_0, window_bounds = array<i64: 4, 384>}, {pipeline_mode = #tpu.pipeline_mode<synchronous>, transform_indices = @transform_1, window_bounds = array<i64: 384, 384>}, {transform_indices = @transform_2, window_bounds = array<i64: 4, 128>}, {transform_indices = @transform_3, window_bounds = array<i64: 4, 128>}, {transform_indices = @transform_4, window_bounds = array<i64: 4, 128>}]} {
    %c0 = arith.constant 0 : index
    %c0_0 = arith.constant 0 : index
    %0 = vector.load %arg2[%c0, %c0_0] : memref<384x384xbf16, #tpu.memory_space<vmem>>, vector<384x384xbf16>
    %c0_1 = arith.constant 0 : index
    %c0_2 = arith.constant 0 : index
    %1 = vector.load %arg1[%c0_1, %c0_2] : memref<4x384xf32, #tpu.memory_space<vmem>>, vector<4x384xf32>
    %2 = arith.truncf %1 : vector<4x384xf32> to vector<4x384xbf16>
    %3 = arith.extf %2 : vector<4x384xbf16> to vector<4x384xf32>
    %4 = arith.subf %1, %3 : vector<4x384xf32>
    %5 = arith.truncf %4 : vector<4x384xf32> to vector<4x384xbf16>
    %6 = arith.extf %5 : vector<4x384xbf16> to vector<4x384xf32>
    %7 = arith.subf %4, %6 : vector<4x384xf32>
    %8 = arith.truncf %7 : vector<4x384xf32> to vector<4x384xbf16>
    %cst = arith.constant dense<0.000000e+00> : vector<4x384xf32>
    %9 = tpu.matmul %2, %0, %cst {dimension_numbers = #tpu.dot_dimension_numbers<[1], [0], [0], [1], [0, 0, 1, 1], [], []>} : vector<4x384xbf16>, vector<384x384xbf16>, vector<4x384xf32> -> vector<4x384xf32>
    %cst_3 = arith.constant dense<0.000000e+00> : vector<4x384xf32>
    %10 = tpu.matmul %5, %0, %cst_3 {dimension_numbers = #tpu.dot_dimension_numbers<[1], [0], [0], [1], [0, 0, 1, 1], [], []>} : vector<4x384xbf16>, vector<384x384xbf16>, vector<4x384xf32> -> vector<4x384xf32>
    %11 = arith.addf %9, %10 : vector<4x384xf32>
    %cst_4 = arith.constant dense<0.000000e+00> : vector<4x384xf32>
    %12 = tpu.matmul %8, %0, %cst_4 {dimension_numbers = #tpu.dot_dimension_numbers<[1], [0], [0], [1], [0, 0, 1, 1], [], []>} : vector<4x384xbf16>, vector<384x384xbf16>, vector<4x384xf32> -> vector<4x384xf32>
    %13 = arith.addf %11, %12 : vector<4x384xf32>
    %14 = vector.extract_strided_slice %13 {offsets = [0, 0], sizes = [4, 128], strides = [1, 1]} : vector<4x384xf32> to vector<4x128xf32>
    %c0_5 = arith.constant 0 : index
    %c0_6 = arith.constant 0 : index
    %15 = vector.load %arg3[%c0_5, %c0_6] : memref<4x128xf32, #tpu.memory_space<vmem>>, vector<4x128xf32>
    tpu.vector_store %arg3[%c0_5, %c0_6], %14 {strides = array<i32>} : memref<4x128xf32, #tpu.memory_space<vmem>>, vector<4x128xf32>,
    %16 = vector.extract_strided_slice %13 {offsets = [0, 128], sizes = [4, 128], strides = [1, 1]} : vector<4x384xf32> to vector<4x128xf32>
    %c0_7 = arith.constant 0 : index
    %c0_8 = arith.constant 0 : index
    %17 = vector.load %arg4[%c0_7, %c0_8] : memref<4x128xf32, #tpu.memory_space<vmem>>, vector<4x128xf32>
    tpu.vector_store %arg4[%c0_7, %c0_8], %16 {strides = array<i32>} : memref<4x128xf32, #tpu.memory_space<vmem>>, vector<4x128xf32>,
    %18 = vector.extract_strided_slice %13 {offsets = [0, 256], sizes = [4, 128], strides = [1, 1]} : vector<4x384xf32> to vector<4x128xf32>
    %c0_9 = arith.constant 0 : index
    %c0_10 = arith.constant 0 : index
    %19 = vector.load %arg5[%c0_9, %c0_10] : memref<4x128xf32, #tpu.memory_space<vmem>>, vector<4x128xf32>
    tpu.vector_store %arg5[%c0_9, %c0_10], %18 {strides = array<i32>} : memref<4x128xf32, #tpu.memory_space<vmem>>, vector<4x128xf32>,
    return
  }
  func.func @transform_0(%arg0: i32) -> (i32, i32) {
    %c0_i32 = arith.constant 0 : i32
    %c0_i32_0 = arith.constant 0 : i32
    return %arg0, %c0_i32 : i32, i32
  }
  func.func @transform_1(%arg0: i32) -> (i32, i32) {
    %c0_i32 = arith.constant 0 : i32
    %c0_i32_0 = arith.constant 0 : i32
    %c0_i32_1 = arith.constant 0 : i32
    return %c0_i32, %c0_i32_0 : i32, i32
  }
  func.func @transform_2(%arg0: i32) -> (i32, i32) {
    %c0_i32 = arith.constant 0 : i32
    %c0_i32_0 = arith.constant 0 : i32
    return %arg0, %c0_i32 : i32, i32
  }
  func.func @transform_3(%arg0: i32) -> (i32, i32) {
    %c0_i32 = arith.constant 0 : i32
    %c0_i32_0 = arith.constant 0 : i32
    return %arg0, %c0_i32 : i32, i32
  }
  func.func @transform_4(%arg0: i32) -> (i32, i32) {
    %c0_i32 = arith.constant 0 : i32
    %c0_i32_0 = arith.constant 0 : i32
    return %arg0, %c0_i32 : i32, i32
  }
}

</mosaic_0001>

<bundles_post_ra>
// kernel: tpu_custom_call.1
= control target key start
LH: loop header
LB: loop body
LE: loop exit
PB: predicated region body
PF: predicated region fallthrough
CT: control target
= control target key end

     0   :  { %10 = vsyncpa [#allocation3], 0  ;;  %s1960_s0 = inlined_call_operand.hbm [shape: f32[4,384], index: 0, kind: input, shape index: {}]   ;;  %s1961_s1 = inlined_call_operand.hbm [shape: bf16[384,384], index: 1, kind: input, shape index: {}]   ;;  %s1962_s2 = inlined_call_operand.hbm [shape: f32[4,128], index: 2, kind: output, shape index: {0}]   ;;  %s1963_s3 = inlined_call_operand.hbm [shape: f32[4,128], index: 3, kind: output, shape index: {1}]   ;;  %s1964_s4 = inlined_call_operand.hbm [shape: f32[4,128], index: 4, kind: output, shape index: {2}]  }
   0x1   :  { %11 = vsyncpa [#allocation6], 0 }
   0x2   :  { %12 = vsyncpa [#allocation4], 0 }
   0x3   :  { %13 = vsyncpa [#allocation9], 0  ;;  %s19_s17 = sshll.u32 %s1960_s0, 4  ;;  %s1512_s18 = smov [#allocation2]   ;;  %s20_s17 = int_to_ptr.hbm [resolvable:$true] %s19_s17 }
   0x4   :  { %s21_s19 = sshll.u32 %s1512_s18, 4  ;;  %s29_s22 = sshll.u32 %s1961_s1, 4  ;;  %s22_s19 = int_to_ptr.vmem [resolvable:$true] %s21_s19  ;;  %s30_s22 = int_to_ptr.hbm [resolvable:$true] %s29_s22 }
   0x5   :  { %24 = dma.hbm_to_vmem [thread:$0]  %s20_s17, 192, %s22_s19, [#allocation3]  }
   0x6   :  { %s1513_s23 = smov [#allocation5]   ;;  %s1514_s25 = smov 192  }
   0x7   :  { %s31_s24 = sshll.u32 %s1513_s23, 4  ;;  %s1515_s26 = smov 12   ;;  %s32_s24 = int_to_ptr.vmem [resolvable:$true] %s31_s24 }
   0x8   :  { %37 = dma.hbm_to_vmem [thread:$0]  %s30_s22, 9216, %s32_s24, [#allocation6], %s1514_s25, %s1514_s25, %s1515_s26  }
   0x9   :  { %1504 = dma.done.wait [#allocation3], 192  }
   0xa   :  { %1505 = vsyncadd [#allocation3], 4294967104 }
   0xb   :  { %1506 = dma.done.wait [#allocation6], 9216  }
   0xc   :  { %1507 = vsyncadd [#allocation6], 4294958080  ;;  %v1103_v0 = vld [vmem:[#allocation5 + $0xa8] sm:$0xf]  ;;  %v1327_v1 = vld [vmem:[#allocation5 + $0xb0] sm:$0xf0] }
   0xd   :  { %v1199_v2 = vld [vmem:[#allocation5 + $0x168] sm:$0xf]  ;;  %v1550_v3 = vor.u32 %v1327_v1, %v1103_v0  ;;  %v1351_v4 = vld [vmem:[#allocation5 + $0x170] sm:$0xf0]  ;;  %v1326_v9 = vld [vmem:[#allocation5 + $0xac] sm:$0xf] }
   0xe   :  { %v1295_v5 = vld [vmem:[#allocation5 + $0x228] sm:$0xf]  ;;  %v1375_v6 = vld [vmem:[#allocation5 + $0x230] sm:$0xf0]  ;;  %v1552_v7 = vor.u32 %v1351_v4, %v1199_v2  ;;  %v1105_v10 = vld [vmem:[#allocation5 + $0xb4] sm:$0xf0] }
   0xf   :  { %v1554_v8 = vor.u32 %v1375_v6, %v1295_v5  ;;  %v1091_v11 = vld [vmem:[#allocation5 + $0x90] sm:$0xf]  ;;  %600 = vmatpush.bf16.msra.mxu0 %v1550_v3  ;;  %v1557_v12 = vor.u32 %v1326_v9, %v1105_v10  ;;  %v1324_v13 = vld [vmem:[#allocation5 + $0x98] sm:$0xf0]  ;;  %v1323_v20 = vld [vmem:[#allocation5 + $0x94] sm:$0xf] }
  0x10   :  { %v1187_v14 = vld [vmem:[#allocation5 + $0x150] sm:$0xf]  ;;  %v1348_v15 = vld [vmem:[#allocation5 + $0x158] sm:$0xf0]  ;;  %613 = vmatpush.bf16.msra.mxu1 %v1552_v7  ;;  %v1561_v16 = vor.u32 %v1324_v13, %v1091_v11  ;;  %v1093_v22 = vld [vmem:[#allocation5 + $0x9c] sm:$0xf0] }
  0x11   :  { %626 = vmatpush.bf16.msra.mxu2 %v1554_v8  ;;  %v1563_v17 = vor.u32 %v1348_v15, %v1187_v14  ;;  %v1283_v18 = vld [vmem:[#allocation5 + $0x210] sm:$0xf]  ;;  %v1372_v19 = vld [vmem:[#allocation5 + $0x218] sm:$0xf0]  ;;  %639 = vmatpush.bf16.msra.mxu3 %v1557_v12  ;;  %v1079_v23 = vld [vmem:[#allocation5 + $0x78] sm:$0xf]  ;;  %v1568_v25 = vor.u32 %v1323_v20, %v1093_v22 }
  0x12   :  { %v1566_v21 = vor.u32 %v1372_v19, %v1283_v18  ;;  %v1321_v24 = vld [vmem:[#allocation5 + $0x80] sm:$0xf0]  ;;  %v1175_v26 = vld [vmem:[#allocation5 + $0x138] sm:$0xf]  ;;  %v1320_v31 = vld [vmem:[#allocation5 + $0x7c] sm:$0xf] }
  0x13   :  { %v1345_v27 = vld [vmem:[#allocation5 + $0x140] sm:$0xf0]  ;;  %v1271_v28 = vld [vmem:[#allocation5 + $0x1f8] sm:$0xf]  ;;  %601 = vmatpush.bf16.msra.mxu0 %v1561_v16  ;;  %v1571_v29 = vor.u32 %v1321_v24, %v1079_v23  ;;  %v1081_v32 = vld [vmem:[#allocation5 + $0x84] sm:$0xf0] }
  0x14   :  { %v1369_v30 = vld [vmem:[#allocation5 + $0x200] sm:$0xf0]  ;;  %614 = vmatpush.bf16.msra.mxu1 %v1563_v17  ;;  %v1575_v33 = vor.u32 %v1345_v27, %v1175_v26  ;;  %v1067_v35 = vld [vmem:[#allocation5 + $0x60] sm:$0xf]  ;;  %v1318_v36 = vld [vmem:[#allocation5 + $0x68] sm:$0xf0]  ;;  %v1580_v38 = vor.u32 %v1320_v31, %v1081_v32 }
  0x15   :  { %627 = vmatpush.bf16.msra.mxu2 %v1566_v21  ;;  %v1577_v34 = vor.u32 %v1369_v30, %v1271_v28  ;;  %v1163_v37 = vld [vmem:[#allocation5 + $0x120] sm:$0xf]  ;;  %640 = vmatpush.bf16.msra.mxu3 %v1568_v25  ;;  %v1342_v39 = vld [vmem:[#allocation5 + $0x128] sm:$0xf0]  ;;  %v1317_v42 = vld [vmem:[#allocation5 + $0x64] sm:$0xf]  ;;  %v1583_v44 = vor.u32 %v1318_v36, %v1067_v35 }
  0x16   :  { %v1259_v40 = vld [vmem:[#allocation5 + $0x1e0] sm:$0xf]  ;;  %v1366_v41 = vld [vmem:[#allocation5 + $0x1e8] sm:$0xf0]  ;;  %v1069_v43 = vld [vmem:[#allocation5 + $0x6c] sm:$0xf0]  ;;  %v1587_v45 = vor.u32 %v1342_v39, %v1163_v37 }
  0x17   :  { %602 = vmatpush.bf16.msra.mxu0 %v1571_v29  ;;  %v1589_v46 = vor.u32 %v1366_v41, %v1259_v40  ;;  %v1055_v47 = vld [vmem:[#allocation5 + $0x48] sm:$0xf]  ;;  %v1315_v48 = vld [vmem:[#allocation5 + $0x50] sm:$0xf0]  ;;  %v1592_v50 = vor.u32 %v1317_v42, %v1069_v43  ;;  %v1314_v54 = vld [vmem:[#allocation5 + $0x4c] sm:$0xf] }
  0x18   :  { %615 = vmatpush.bf16.msra.mxu1 %v1575_v33  ;;  %v1151_v49 = vld [vmem:[#allocation5 + $0x108] sm:$0xf]  ;;  %v1339_v51 = vld [vmem:[#allocation5 + $0x110] sm:$0xf0]  ;;  %v1057_v55 = vld [vmem:[#allocation5 + $0x54] sm:$0xf0]  ;;  %v1595_v56 = vor.u32 %v1315_v48, %v1055_v47 }
  0x19   :  { %628 = vmatpush.bf16.msra.mxu2 %v1577_v34  ;;  %641 = vmatpush.bf16.msra.mxu3 %v1580_v38  ;;  %2009 = vst [vmem:[#allocation15_spill] sm:$0xff] %v1592_v50  ;;  %v1247_v52 = vld [vmem:[#allocation5 + $0x1c8] sm:$0xf]  ;;  %v1363_v53 = vld [vmem:[#allocation5 + $0x1d0] sm:$0xf0]  ;;  %v1599_v57 = vor.u32 %v1339_v51, %v1151_v49  ;;  %v1604_v62 = vor.u32 %v1314_v54, %v1057_v55  ;;  %vm163_vm0 = vcmask 1043456  }
  0x1a   :  { %v1601_v58 = vor.u32 %v1363_v53, %v1247_v52  ;;  %v1043_v59 = vld [vmem:[#allocation5 + $0x30] sm:$0xf]  ;;  %v1312_v60 = vld [vmem:[#allocation5 + $0x38] sm:$0xf0]  ;;  %v1311_v2 = vld [vmem:[#allocation5 + $0x34] sm:$0xf] }
  0x1b   :  { %603 = vmatpush.bf16.msra.mxu0 %v1583_v44  ;;  %v1139_v61 = vld [vmem:[#allocation5 + $0xf0] sm:$0xf]  ;;  %2010 = vst [vmem:[#allocation16_spill] sm:$0xff] %v1604_v62  ;;  %v1336_v63 = vld [vmem:[#allocation5 + $0xf8] sm:$0xf0]  ;;  %v1607_v5 = vor.u32 %v1312_v60, %v1043_v59  ;;  %s1516_s0 = smov [#allocation7]  }
  0x1c   :  { %616 = vmatpush.bf16.msra.mxu1 %v1587_v45  ;;  %v1235_v0 = vld [vmem:[#allocation5 + $0x1b0] sm:$0xf]  ;;  %v1360_v1 = vld [vmem:[#allocation5 + $0x1b8] sm:$0xf0]  ;;  %v1045_v4 = vld [vmem:[#allocation5 + $0x3c] sm:$0xf0]  ;;  %v1611_v6 = vor.u32 %v1336_v63, %v1139_v61 }
  0x1d   :  { %629 = vmatpush.bf16.msra.mxu2 %v1589_v46  ;;  %642 = vmatpush.bf16.msra.mxu3 %v1592_v50  ;;  %v1613_v9 = vor.u32 %v1360_v1, %v1235_v0  ;;  %v1031_v10 = vld [vmem:[#allocation5 + $0x18] sm:$0xf]  ;;  %v1309_v11 = vld [vmem:[#allocation5 + $0x20] sm:$0xf0]  ;;  %v1616_v14 = vor.u32 %v1311_v2, %v1045_v4  ;;  %v1308_v20 = vld [vmem:[#allocation5 + $0x1c] sm:$0xf] }
  0x1e   :  { %v1127_v13 = vld [vmem:[#allocation5 + $0xd8] sm:$0xf]  ;;  %v1333_v15 = vld [vmem:[#allocation5 + $0xe0] sm:$0xf0]  ;;  %v1033_v22 = vld [vmem:[#allocation5 + $0x24] sm:$0xf0]  ;;  %v1619_v23 = vor.u32 %v1309_v11, %v1031_v10 }
  0x1f   :  { %604 = vmatpush.bf16.msra.mxu0 %v1595_v56  ;;  %2011 = vst [vmem:[#allocation17_spill] sm:$0xff] %v1616_v14  ;;  %v1223_v18 = vld [vmem:[#allocation5 + $0x198] sm:$0xf]  ;;  %v1357_v19 = vld [vmem:[#allocation5 + $0x1a0] sm:$0xf0]  ;;  %v1623_v27 = vor.u32 %v1333_v15, %v1127_v13  ;;  %v1628_v35 = vor.u32 %v1308_v20, %v1033_v22  ;;  %s973_s1 = sshll.u32 %s1516_s0, 4  ;;  %s974_s1 = int_to_ptr.vmem [resolvable:$true] %s973_s1 }
  0x20   :  { %617 = vmatpush.bf16.msra.mxu1 %v1599_v57  ;;  %v1019_v24 = vld [vmem:[#allocation5] sm:$0xf]  ;;  %v1306_v26 = vld [vmem:[#allocation5 + $0x8] sm:$0xf0]  ;;  %v1625_v28 = vor.u32 %v1357_v19, %v1223_v18  ;;  %v1305_v37 = vld [vmem:[#allocation5 + $0x4] sm:$0xf] }
  0x21   :  { %630 = vmatpush.bf16.msra.mxu2 %v1601_v58  ;;  %643 = vmatpush.bf16.msra.mxu3 %v1604_v62  ;;  %v1115_v30 = vld [vmem:[#allocation5 + $0xc0] sm:$0xf]  ;;  %v1330_v31 = vld [vmem:[#allocation5 + $0xc8] sm:$0xf0]  ;;  %2012 = vst [vmem:[#allocation18_spill] sm:$0xff] %v1628_v35  ;;  %v1631_v43 = vor.u32 %v1306_v26, %v1019_v24  ;;  %s975_s29 = sshll.u32 %s1962_s2, 4  ;;  %s976_s29 = int_to_ptr.hbm [resolvable:$true] %s975_s29 }
  0x22   :  { %v1211_v32 = vld [vmem:[#allocation5 + $0x180] sm:$0xf]  ;;  %v1354_v36 = vld [vmem:[#allocation5 + $0x188] sm:$0xf0]  ;;  %v1021_v39 = vld [vmem:[#allocation5 + $0xc] sm:$0xf0]  ;;  %v1635_v51 = vor.u32 %v1330_v31, %v1115_v30 }
  0x23   :  { %605 = vmatpush.bf16.msra.mxu0 %v1607_v5  ;;  %v1350_v40 = vld [vmem:[#allocation5 + $0x16c] sm:$0xf]  ;;  %v1201_v41 = vld [vmem:[#allocation5 + $0x174] sm:$0xf0]  ;;  %v1111_v48 = vld [vmem:[#allocation5 + $0xb0] sm:$0xf]  ;;  %v1637_v52 = vor.u32 %v1354_v36, %v1211_v32  ;;  %v1640_v55 = vor.u32 %v1305_v37, %v1021_v39 }
  0x24   :  { %618 = vmatpush.bf16.msra.mxu1 %v1611_v6  ;;  %v1374_v42 = vld [vmem:[#allocation5 + $0x22c] sm:$0xf]  ;;  %v1297_v47 = vld [vmem:[#allocation5 + $0x234] sm:$0xf0]  ;;  %v1328_v49 = vld [vmem:[#allocation5 + $0xb8] sm:$0xf0]  ;;  %v1642_v59 = vor.u32 %v1350_v40, %v1201_v41 }
  0x25   :  { %631 = vmatpush.bf16.msra.mxu2 %v1613_v9  ;;  %644 = vmatpush.bf16.msra.mxu3 %v1616_v14  ;;  %v1207_v53 = vld [vmem:[#allocation5 + $0x170] sm:$0xf]  ;;  %v1352_v54 = vld [vmem:[#allocation5 + $0x178] sm:$0xf0]  ;;  %2013 = vst [vmem:[#allocation19_spill] sm:$0xff] %v1640_v55  ;;  %v1644_v60 = vor.u32 %v1374_v42, %v1297_v47  ;;  %v1646_v61 = vor.u32 %v1328_v49, %v1111_v48  ;;  %s1517_s30 = smov [#allocation8]  }
  0x26   :  { %v1347_v63 = vld [vmem:[#allocation5 + $0x154] sm:$0xf]  ;;  %v1189_v0 = vld [vmem:[#allocation5 + $0x15c] sm:$0xf0]  ;;  %v1649_v2 = vor.u32 %v1352_v54, %v1207_v53  ;;  %v1099_v10 = vld [vmem:[#allocation5 + $0x98] sm:$0xf] }
  0x27   :  { %606 = vmatpush.bf16.msra.mxu0 %v1619_v23  ;;  %2014 = vst [vmem:[#allocation20_spill] sm:$0xff] %v1646_v61  ;;  %v1371_v1 = vld [vmem:[#allocation5 + $0x214] sm:$0xf]  ;;  %v1285_v4 = vld [vmem:[#allocation5 + $0x21c] sm:$0xf0]  ;;  %v1655_v18 = vor.u32 %v1347_v63, %v1189_v0  ;;  %s984_s5 = sshll.u32 %s1517_s30, 4  ;;  %s985_s5 = int_to_ptr.vmem [resolvable:$true] %s984_s5 }
  0x28   :  { %619 = vmatpush.bf16.msra.mxu1 %v1623_v27  ;;  %2015 = vst [vmem:[#allocation21_spill] sm:$0xff] %v1649_v2  ;;  %v1325_v11 = vld [vmem:[#allocation5 + $0xa0] sm:$0xf0]  ;;  %v1195_v13 = vld [vmem:[#allocation5 + $0x158] sm:$0xf]  ;;  %v1659_v19 = vor.u32 %v1371_v1, %v1285_v4  ;;  %s986_s8 = sshll.u32 %s1963_s3, 4  ;;  %s987_s8 = int_to_ptr.hbm [resolvable:$true] %s986_s8 }
  0x29   :  { %632 = vmatpush.bf16.msra.mxu2 %v1625_v28  ;;  %645 = vmatpush.bf16.msra.mxu3 %v1628_v35  ;;  %v1349_v15 = vld [vmem:[#allocation5 + $0x160] sm:$0xf0]  ;;  %v1661_v20 = vor.u32 %v1325_v11, %v1099_v10  ;;  %v1344_v22 = vld [vmem:[#allocation5 + $0x13c] sm:$0xf]  ;;  %v1177_v24 = vld [vmem:[#allocation5 + $0x144] sm:$0xf0] }
  0x2a   :  { %v1368_v26 = vld [vmem:[#allocation5 + $0x1fc] sm:$0xf]  ;;  %v1664_v30 = vor.u32 %v1349_v15, %v1195_v13  ;;  %v1273_v31 = vld [vmem:[#allocation5 + $0x204] sm:$0xf0]  ;;  %v1087_v32 = vld [vmem:[#allocation5 + $0x80] sm:$0xf]  ;;  %v1667_v40 = vor.u32 %v1344_v22, %v1177_v24 }
  0x2b   :  { %607 = vmatpush.bf16.msra.mxu0 %v1631_v43  ;;  %2016 = vst [vmem:[#allocation22_spill] sm:$0xff] %v1661_v20  ;;  %v1322_v36 = vld [vmem:[#allocation5 + $0x88] sm:$0xf0]  ;;  %v1183_v37 = vld [vmem:[#allocation5 + $0x140] sm:$0xf]  ;;  %v1671_v47 = vor.u32 %v1368_v26, %v1273_v31  ;;  %v1678_v11 = vld [vmem:[#allocation2] sm:$0xff] }
  0x2c   :  { %620 = vmatpush.bf16.msra.mxu1 %v1635_v51  ;;  %2017 = vst [vmem:[#allocation23_spill] sm:$0xff] %v1664_v30  ;;  %v1346_v39 = vld [vmem:[#allocation5 + $0x148] sm:$0xf0]  ;;  %v1341_v41 = vld [vmem:[#allocation5 + $0x124] sm:$0xf]  ;;  %v1673_v48 = vor.u32 %v1322_v36, %v1087_v32  ;;  %s1518_s2 = smov [#allocation10]  }
  0x2d   :  { %633 = vmatpush.bf16.msra.mxu2 %v1637_v52  ;;  %646 = vmatpush.bf16.msra.mxu3 %v1640_v55  ;;  %v143_v42 = vld [vmem:[#allocation2 + $0x8] sm:$0xf]  ;;  %v1165_v49 = vld [vmem:[#allocation5 + $0x12c] sm:$0xf0]  ;;  %v1365_v53 = vld [vmem:[#allocation5 + $0x1e4] sm:$0xf]  ;;  %v1676_v54 = vor.u32 %v1346_v39, %v1183_v37 }
  0x2e   :  { %2018 = vst [vmem:[#allocation24_spill] sm:$0xff] %v1673_v48  ;;  %v1261_v63 = vld [vmem:[#allocation5 + $0x1ec] sm:$0xf0]  ;;  %v1075_v0 = vld [vmem:[#allocation5 + $0x68] sm:$0xf]  ;;  %v1681_v13 = vor.u32 %v1341_v41, %v1165_v49  ;;  %s995_s9 = sshll.u32 %s1518_s2, 4  ;;  %s996_s9 = int_to_ptr.vmem [resolvable:$true] %s995_s9 }
  0x2f   :  { %652 = vmatpush.bf16.msrb.mxu0 %v1642_v59  ;;  %148 = vst [vmem:[#allocation1 + $0x10] ss:$2 sm:$0xff] %v143_v42  ;;  %v1319_v1 = vld [vmem:[#allocation5 + $0x70] sm:$0xf0]  ;;  %v1171_v4 = vld [vmem:[#allocation5 + $0x128] sm:$0xf]  ;;  %v1686_v15 = vor.u32 %v1365_v53, %v1261_v63 }
  0x30   :  { %665 = vmatpush.bf16.msrb.mxu1 %v1644_v60  ;;  %2019 = vst [vmem:[#allocation25_spill] sm:$0xff] %v1676_v54  ;;  %v1343_v10 = vld [vmem:[#allocation5 + $0x130] sm:$0xf0]  ;;  %v1688_v22 = vor.u32 %v1319_v1, %v1075_v0  ;;  %v1338_v24 = vld [vmem:[#allocation5 + $0x10c] sm:$0xf]  ;;  %s997_s3 = sshll.u32 %s1964_s4, 4  ;;  %s998_s3 = int_to_ptr.hbm [resolvable:$true] %s997_s3 }
  0x31   :  { %678 = vmatpush.bf16.msrb.mxu2 %v1646_v61  ;;  %691 = vmatpush.bf16.msrb.mxu3 %v1649_v2  ;;  %2020 = vst [vmem:[#allocation26_spill] sm:$0xff] %v1681_v13  ;;  %v1153_v26 = vld [vmem:[#allocation5 + $0x114] sm:$0xf0]  ;;  %v1362_v31 = vld [vmem:[#allocation5 + $0x1cc] sm:$0xf]  ;;  %v1691_v32 = vor.u32 %v1343_v10, %v1171_v4 }
  0x32   :  { %146 = vst [vmem:[#allocation1] ss:$2 sm:$0xff] %v1678_v11  ;;  %v1249_v36 = vld [vmem:[#allocation5 + $0x1d4] sm:$0xf0]  ;;  %v1063_v37 = vld [vmem:[#allocation5 + $0x50] sm:$0xf]  ;;  %v1694_v2 = vor.u32 %v1338_v24, %v1153_v26 }
  0x33   :  { %653 = vmatpush.bf16.msrb.mxu0 %v1655_v18  ;;  %2021 = vst [vmem:[#allocation27_spill] sm:$0xff] %v1688_v22  ;;  %v1316_v39 = vld [vmem:[#allocation5 + $0x58] sm:$0xf0]  ;;  %v1159_v41 = vld [vmem:[#allocation5 + $0x110] sm:$0xf]  ;;  %v1698_v0 = vor.u32 %v1362_v31, %v1249_v36 }
  0x34   :  { %666 = vmatpush.bf16.msrb.mxu1 %v1659_v19  ;;  %2022 = vst [vmem:[#allocation28_spill] sm:$0xff] %v1691_v32  ;;  %v1340_v49 = vld [vmem:[#allocation5 + $0x118] sm:$0xf0]  ;;  %v1141_v53 = vld [vmem:[#allocation5 + $0xfc] sm:$0xf0]  ;;  %v1700_v1 = vor.u32 %v1316_v39, %v1063_v37 }
  0x35   :  { %679 = vmatpush.bf16.msrb.mxu2 %v1661_v20  ;;  %692 = vmatpush.bf16.msrb.mxu3 %v1664_v30  ;;  %v1335_v30 = vld [vmem:[#allocation5 + $0xf4] sm:$0xf]  ;;  %2023 = vst [vmem:[#allocation29_spill] sm:$0xff] %v1694_v2  ;;  %v1237_v10 = vld [vmem:[#allocation5 + $0x1bc] sm:$0xf0]  ;;  %v1705_v35 = vor.u32 %v1340_v49, %v1159_v41 }
  0x36   :  { %v151_v63 = vld.sshfl [vmem:[#allocation1 + $0x10] sm:$0xff pattern:$0x75316420]  ;;  %2024 = vst [vmem:[#allocation30_spill] sm:$0xff] %v1698_v0  ;;  %v1359_v4 = vld [vmem:[#allocation5 + $0x1b4] sm:$0xf]  ;;  %v1709_v31 = vor.u32 %v1335_v30, %v1141_v53 }
  0x37   :  { %654 = vmatpush.bf16.msrb.mxu0 %v1667_v40  ;;  %2025 = vst [vmem:[#allocation31_spill] sm:$0xff] %v1700_v1  ;;  %v1702_v55 = vpack.c.bf16 %v151_v63, %v151_v63  ;;  %v1313_v24 = vld [vmem:[#allocation5 + $0x40] sm:$0xf0]  ;;  %v1147_v26 = vld [vmem:[#allocation5 + $0xf8] sm:$0xf]  ;;  %v1715_v39 = vor.u32 %v1359_v4, %v1237_v10 }
  0x38   :  { %667 = vmatpush.bf16.msrb.mxu1 %v1671_v47  ;;  %2026 = vst [vmem:[#allocation32_spill] sm:$0xff] %v1705_v35  ;;  %v1337_v14 = vld [vmem:[#allocation5 + $0x100] sm:$0xf0]  ;;  %v1332_v36 = vld [vmem:[#allocation5 + $0xdc] sm:$0xf] }
  0x39   :  { %680 = vmatpush.bf16.msrb.mxu2 %v1673_v48  ;;  %693 = vmatpush.bf16.msrb.mxu3 %v1676_v54  ;;  %v1051_v54 = vld [vmem:[#allocation5 + $0x38] sm:$0xf]  ;;  %v159_v62 = vunpack.c.l.bf16 %v1702_v55  ;;  %2027 = vst [vmem:[#allocation33_spill] sm:$0xff] %v1709_v31  ;;  %v1129_v63 = vld [vmem:[#allocation5 + $0xe4] sm:$0xf0] }
  0x3a   :  { %2028 = vst [vmem:[#allocation34_spill] sm:$0xff] %v1715_v39  ;;  %v1717_v41 = vor.u32 %v1313_v24, %v1051_v54  ;;  %v1225_v50 = vld [vmem:[#allocation5 + $0x1a4] sm:$0xf0]  ;;  %v1039_v30 = vld [vmem:[#allocation5 + $0x20] sm:$0xf] }
  0x3b   :  { %655 = vmatpush.bf16.msrb.mxu0 %v1681_v13  ;;  %v149_v13 = vld.sshfl [vmem:[#allocation1] sm:$0xff pattern:$0x75316420]  ;;  %v167_v49 = vsub.f32 %v143_v42, %v159_v62  ;;  %v1725_v62 = vor.u32 %v1332_v36, %v1129_v63  ;;  %v1329_v10 = vld [vmem:[#allocation5 + $0xc4] sm:$0xf] }
  0x3c   :  { %668 = vmatpush.bf16.msrb.mxu1 %v1686_v15  ;;  %2029 = vst [vmem:[#allocation35_spill] sm:$0xff] %v1717_v41  ;;  %v1310_v53 = vld [vmem:[#allocation5 + $0x28] sm:$0xf0]  ;;  %v1117_v24 = vld [vmem:[#allocation5 + $0xcc] sm:$0xf0] }
  0x3d   :  { %681 = vmatpush.bf16.msrb.mxu2 %v1688_v22  ;;  %694 = vmatpush.bf16.msrb.mxu3 %v1691_v32  ;;  %v150_v22 = vld.sshfl [vmem:[#allocation1 + $0x8] sm:$0xff pattern:$0x75316420]  ;;  %v1356_v32 = vld [vmem:[#allocation5 + $0x19c] sm:$0xf]  ;;  %v1731_v54 = vor.u32 %v1310_v53, %v1039_v30 }
  0x3e   :  { %v1711_v37 = vpack.c.bf16 %v150_v22, %v149_v13  ;;  %v1135_v13 = vld [vmem:[#allocation5 + $0xe0] sm:$0xf]  ;;  %172 = vst [vmem:[#allocation1 + $0x10] ss:$2 sm:$0xff] %v167_v49  ;;  %v1334_v4 = vld [vmem:[#allocation5 + $0xe8] sm:$0xf0] }
  0x3f   :  { %656 = vmatpush.bf16.msrb.mxu0 %v1694_v2  ;;  %v1720_v2 = vor.u32 %v1337_v14, %v1147_v26  ;;  %v1729_v14 = vor.u32 %v1356_v32, %v1225_v50  ;;  %v1353_v26 = vld [vmem:[#allocation5 + $0x184] sm:$0xf]  ;;  %v1213_v36 = vld [vmem:[#allocation5 + $0x18c] sm:$0xf0]  ;;  %v1027_v63 = vld [vmem:[#allocation5 + $0x8] sm:$0xf]  ;;  %v1739_v50 = vor.u32 %v1329_v10, %v1117_v24 }
  0x40   :  { %669 = vmatpush.bf16.msrb.mxu1 %v1698_v0  ;;  %v157_v22 = vunpack.c.l.bf16 %v1711_v37  ;;  %v158_v0 = vunpack.c.h.bf16 %v1711_v37  ;;  %v1743_v32 = vor.u32 %v1353_v26, %v1213_v36  ;;  %v1376_v26 = vld [vmem:[#allocation5 + $0x238] sm:$0xf0] }
  0x41   :  { %682 = vmatpush.bf16.msrb.mxu2 %v1700_v1  ;;  %695 = vmatpush.bf16.msrb.mxu3 %v1705_v35  ;;  %v1734_v35 = vor.u32 %v1334_v4, %v1135_v13 }
  0x42   :  { %v162_v42 = vrot.slane %v158_v0, 4  ;;  %v1307_v0 = vld [vmem:[#allocation5 + $0x10] sm:$0xf0] }
  0x43   :  { %657 = vmatpush.bf16.msrb.mxu0 %v1709_v31  ;;  %2030 = vst [vmem:[#allocation36_spill] sm:$0xff] %v1734_v35  ;;  %v1745_v30 = vor.u32 %v1307_v0, %v1027_v63 }
  0x44   :  { %670 = vmatpush.bf16.msrb.mxu1 %v1715_v39  ;;  %v164_v31 = vsel %vm163_vm0, %v157_v22, %v162_v42  ;;  %v1123_v39 = vld [vmem:[#allocation5 + $0xc8] sm:$0xf] }
  0x45   :  { %683 = vmatpush.bf16.msrb.mxu2 %v1717_v41  ;;  %696 = vmatpush.bf16.msrb.mxu3 %v1720_v2  ;;  %v166_v1 = vsub.f32 %v1678_v11, %v164_v31  ;;  %v1331_v41 = vld [vmem:[#allocation5 + $0xd0] sm:$0xf0]  ;;  %2031 = vst [vmem:[#allocation37_spill] sm:$0xff] %v1745_v30  ;;  %v175_v53 = vld.sshfl [vmem:[#allocation1 + $0x10] sm:$0xff pattern:$0x75316420] }
  0x46   :  { %v1748_v13 = vor.u32 %v1331_v41, %v1123_v39  ;;  %v180_v11 = vpack.c.bf16 %v175_v53, %v175_v53  ;;  %v1303_v41 = vld [vmem:[#allocation5 + $0x230] sm:$0xf] }
  0x47   :  { %658 = vmatpush.bf16.msrb.mxu0 %v1725_v62  ;;  %170 = vst [vmem:[#allocation1] ss:$2 sm:$0xff] %v166_v1 }
  0x48   :  { %671 = vmatpush.bf16.msrb.mxu1 %v1729_v14  ;;  %2032 = vst [vmem:[#allocation38_spill] sm:$0xff] %v1748_v13  ;;  %v183_v31 = vunpack.c.l.bf16 %v180_v11  ;;  %v209_v22 = vunpack.c.l.b16 %v180_v11  ;;  %v1758_v11 = vor.u32 %v1376_v26, %v1303_v41  ;;  %v1370_v41 = vld [vmem:[#allocation5 + $0x208] sm:$0xf0] }
  0x49   :  { %684 = vmatpush.bf16.msrb.mxu2 %v1731_v54  ;;  %697 = vmatpush.bf16.msrb.mxu3 %v1734_v35  ;;  %v1373_v35 = vld [vmem:[#allocation5 + $0x220] sm:$0xf0] }
  0x4a   :  { %v190_v4 = vsub.f32 %v167_v49, %v183_v31  ;;  %v1754_v42 = vpack.c.b16 %v209_v22, %v209_v22  ;;  %v1291_v22 = vld [vmem:[#allocation5 + $0x218] sm:$0xf] }
  0x4b   :  { %659 = vmatpush.bf16.msrb.mxu0 %v1739_v50 }
  0x4c   :  { %672 = vmatpush.bf16.msrb.mxu1 %v1743_v32  ;;  %195 = vst [vmem:[#allocation1 + $0x10] ss:$2 sm:$0xff] %v190_v4  ;;  %634 = vmatmul.bf16.vlgmr.msra.gmra.mxu2 %v1754_v42 }
  0x4d   :  { %685 = vmatpush.bf16.msrb.mxu2 %v1745_v30  ;;  %698 = vmatpush.bf16.msrb.mxu3 %v1748_v13 }
  0x4e   :  { %v173_v10 = vld.sshfl [vmem:[#allocation1] sm:$0xff pattern:$0x75316420]  ;;  %v174_v24 = vld.sshfl [vmem:[#allocation1 + $0x8] sm:$0xff pattern:$0x75316420] }
  0x4f   :  { %v179_v39 = vpack.c.bf16 %v174_v24, %v173_v10  ;;  %v1763_v24 = vor.u32 %v1373_v35, %v1291_v22  ;;  %v1367_v35 = vld [vmem:[#allocation5 + $0x1f0] sm:$0xf0]  ;;  %v1361_v22 = vld [vmem:[#allocation5 + $0x1c0] sm:$0xf0] }
  0x51   :  { %741 = vmatpush.bf16.msra.mxu2 %v1552_v7  ;;  %v181_v36 = vunpack.c.l.bf16 %v179_v39  ;;  %v182_v63 = vunpack.c.h.bf16 %v179_v39  ;;  %v207_v0 = vunpack.c.l.b16 %v179_v39  ;;  %v208_v53 = vunpack.c.h.b16 %v179_v39  ;;  %v1279_v39 = vld [vmem:[#allocation5 + $0x200] sm:$0xf] }
  0x53   :  { %v186_v13 = vrot.slane %v182_v63, 4  ;;  %v210_v49 = vpack.c.b16 %v207_v0, %v207_v0  ;;  %v211_v31 = vpack.c.b16 %v208_v53, %v208_v53  ;;  %v1364_v63 = vld [vmem:[#allocation5 + $0x1d8] sm:$0xf0]  ;;  %v1243_v53 = vld [vmem:[#allocation5 + $0x1b8] sm:$0xf] }
  0x55   :  { %742 = vmatpush.bf16.msra.mxu2 %v1563_v17  ;;  %v187_v4 = vsel %vm163_vm0, %v181_v36, %v186_v13  ;;  %608 = vmatmul.bf16.vlgmr.msra.gmra.mxu0 %v210_v49  ;;  %v1769_v13 = vor.u32 %v1370_v41, %v1279_v39  ;;  %v1255_v36 = vld [vmem:[#allocation5 + $0x1d0] sm:$0xf]  ;;  %v720_v39 = vunpack.c.h.b16 %v1711_v37 }
  0x56   :  { %621 = vmatmul.bf16.vlgmr.msra.gmra.mxu1 %v211_v31  ;;  %v189_v10 = vsub.f32 %v166_v1, %v187_v4  ;;  %647 = vmatmul.bf16.vlgmr.msra.gmra.mxu3 %v210_v49  ;;  %v1267_v1 = vld [vmem:[#allocation5 + $0x1e8] sm:$0xf]  ;;  %v1781_v0 = vor.u32 %v1364_v63, %v1255_v36  ;;  %v1231_v4 = vld [vmem:[#allocation5 + $0x1a0] sm:$0xf]  ;;  %v719_v63 = vunpack.c.l.b16 %v1711_v37  ;;  %v2034_v37 = vld [vmem:[#allocation15_spill] sm:$0xff] }
  0x57   :  { %704 = vmatpush.bf16.msra.mxu0 %v1758_v11  ;;  %728 = vmatpush.bf16.msra.mxu1 %v1550_v3  ;;  %v1775_v26 = vor.u32 %v1367_v35, %v1267_v1  ;;  %v1219_v1 = vld [vmem:[#allocation5 + $0x188] sm:$0xf]  ;;  %v1355_v35 = vld [vmem:[#allocation5 + $0x190] sm:$0xf0]  ;;  %v1799_v36 = vpack.c.b16 %v720_v39, %v720_v39  ;;  %v2036_v39 = vld [vmem:[#allocation27_spill] sm:$0xff] }
  0x58   :  { %754 = vmatpush.bf16.msra.mxu3 %v1554_v8  ;;  %193 = vst [vmem:[#allocation1] ss:$2 sm:$0xff] %v189_v10  ;;  %v1358_v10 = vld [vmem:[#allocation5 + $0x1a8] sm:$0xf0] }
  0x59   :  { %743 = vmatpush.bf16.msra.mxu2 %v1575_v33  ;;  %v1795_v41 = vor.u32 %v1358_v10, %v1231_v4  ;;  %v2035_v10 = vld [vmem:[#allocation26_spill] sm:$0xff] }
  0x5b   :  { %705 = vmatpush.bf16.msra.mxu0 %v1763_v24  ;;  %729 = vmatpush.bf16.msra.mxu1 %v1561_v16 }
  0x5c   :  { %755 = vmatpush.bf16.msra.mxu3 %v1566_v21  ;;  %686 = vmatmul.bf16.vlgmr.msrb.gmra.mxu2 %v210_v49  ;;  %v1788_v49 = vor.u32 %v1361_v22, %v1243_v53  ;;  %v721_v53 = vunpack.c.l.b16 %v1702_v55  ;;  %v722_v22 = vpack.c.b16 %v719_v63, %v719_v63  ;;  %v2033_v55 = vld [vmem:[#allocation30_spill] sm:$0xff]  ;;  %v2040_v63 = vld [vmem:[#allocation31_spill] sm:$0xff] }
  0x5d   :  { %744 = vmatpush.bf16.msra.mxu2 %v1587_v45 }
  0x5e   :  { %v1812_v4 = vpack.c.b16 %v721_v53, %v721_v53  ;;  %v2041_v53 = vld [vmem:[#allocation17_spill] sm:$0xff] }
  0x5f   :  { %706 = vmatpush.bf16.msra.mxu0 %v1769_v13  ;;  %730 = vmatpush.bf16.msra.mxu1 %v1571_v29 }
  0x60   :  { %756 = vmatpush.bf16.msra.mxu3 %v1577_v34 }
  0x61   :  { %745 = vmatpush.bf16.msra.mxu2 %v1599_v57 }
  0x63   :  { %707 = vmatpush.bf16.msra.mxu0 %v1775_v26  ;;  %731 = vmatpush.bf16.msra.mxu1 %v1583_v44 }
  0x64   :  { %757 = vmatpush.bf16.msra.mxu3 %v1589_v46 }
  0x65   :  { %746 = vmatpush.bf16.msra.mxu2 %v1611_v6  ;;  %660 = vmatmul.bf16.vlgmr.msrb.gmra.mxu0 %v211_v31 }
  0x66   :  { %673 = vmatmul.bf16.vlgmr.msrb.gmra.mxu1 %v1754_v42  ;;  %699 = vmatmul.bf16.vlgmr.msrb.gmra.mxu3 %v211_v31  ;;  %v1803_v31 = vor.u32 %v1355_v35, %v1219_v1  ;;  %v2037_v1 = vld [vmem:[#allocation34_spill] sm:$0xff]  ;;  %v2038_v35 = vld [vmem:[#allocation16_spill] sm:$0xff] }
  0x67   :  { %708 = vmatpush.bf16.msra.mxu0 %v1781_v0  ;;  %732 = vmatpush.bf16.msra.mxu1 %v1595_v56 }
  0x68   :  { %758 = vmatpush.bf16.msra.mxu3 %v1601_v58 }
  0x69   :  { %747 = vmatpush.bf16.msra.mxu2 %v1623_v27 }
  0x6b   :  { %709 = vmatpush.bf16.msra.mxu0 %v1788_v49  ;;  %733 = vmatpush.bf16.msra.mxu1 %v1607_v5 }
  0x6c   :  { %759 = vmatpush.bf16.msra.mxu3 %v1613_v9 }
  0x6d   :  { %748 = vmatpush.bf16.msra.mxu2 %v1635_v51 }
  0x6f   :  { %710 = vmatpush.bf16.msra.mxu0 %v1795_v41  ;;  %734 = vmatpush.bf16.msra.mxu1 %v1619_v23 }
  0x70   :  { %760 = vmatpush.bf16.msra.mxu3 %v1625_v28  ;;  %749 = vmatmul.bf16.vlgmr.msra.gmra.mxu2 %v1799_v36 }
  0x71   :  { %793 = vmatpush.bf16.msrb.mxu2 %v1644_v60 }
  0x73   :  { %711 = vmatpush.bf16.msra.mxu0 %v1803_v31  ;;  %735 = vmatpush.bf16.msra.mxu1 %v1631_v43 }
  0x74   :  { %761 = vmatpush.bf16.msra.mxu3 %v1637_v52 }
  0x75   :  { %794 = vmatpush.bf16.msrb.mxu2 %v1659_v19 }
  0x76   :  { %736 = vmatmul.bf16.vlgmr.msra.gmra.mxu1 %v722_v22  ;;  %712 = vmatmul.bf16.vlgmr.msra.gmra.mxu0 %v1754_v42  ;;  %v2039_v42 = vld [vmem:[#allocation29_spill] sm:$0xff] }
  0x77   :  { %767 = vmatpush.bf16.msrb.mxu0 %v1557_v12  ;;  %780 = vmatpush.bf16.msrb.mxu1 %v1642_v59 }
  0x78   :  { %806 = vmatpush.bf16.msrb.mxu3 %v1646_v61  ;;  %v2044_v61 = vld [vmem:[#allocation18_spill] sm:$0xff] }
  0x79   :  { %762 = vmatmul.bf16.vlgmr.msra.gmra.mxu3 %v1812_v4  ;;  %795 = vmatpush.bf16.msrb.mxu2 %v1671_v47 }
  0x7b   :  { %768 = vmatpush.bf16.msrb.mxu0 %v1568_v25  ;;  %781 = vmatpush.bf16.msrb.mxu1 %v1655_v18 }
  0x7c   :  { %807 = vmatpush.bf16.msrb.mxu3 %v1661_v20  ;;  %v2043_v20 = vld [vmem:[#allocation35_spill] sm:$0xff] }
  0x7d   :  { %796 = vmatpush.bf16.msrb.mxu2 %v1686_v15 }
  0x7f   :  { %769 = vmatpush.bf16.msrb.mxu0 %v1580_v38  ;;  %782 = vmatpush.bf16.msrb.mxu1 %v1667_v40 }
  0x80   :  { %808 = vmatpush.bf16.msrb.mxu3 %v1673_v48  ;;  %v2042_v48 = vld [vmem:[#allocation33_spill] sm:$0xff] }
  0x81   :  { %797 = vmatpush.bf16.msrb.mxu2 %v2033_v55 }
  0x83   :  { %770 = vmatpush.bf16.msrb.mxu0 %v2034_v37  ;;  %783 = vmatpush.bf16.msrb.mxu1 %v2035_v10 }
  0x84   :  { %809 = vmatpush.bf16.msrb.mxu3 %v2036_v39  ;;  %v2046_v39 = vld [vmem:[#allocation21_spill] sm:$0xff] }
  0x85   :  { %798 = vmatpush.bf16.msrb.mxu2 %v2037_v1 }
  0x87   :  { %771 = vmatpush.bf16.msrb.mxu0 %v2038_v35  ;;  %784 = vmatpush.bf16.msrb.mxu1 %v2039_v42 }
  0x88   :  { %810 = vmatpush.bf16.msrb.mxu3 %v2040_v63  ;;  %v2045_v63 = vld [vmem:[#allocation19_spill] sm:$0xff] }
  0x89   :  { %799 = vmatpush.bf16.msrb.mxu2 %v1729_v14 }
  0x8b   :  { %772 = vmatpush.bf16.msrb.mxu0 %v2041_v53  ;;  %785 = vmatpush.bf16.msrb.mxu1 %v2042_v48 }
  0x8c   :  { %811 = vmatpush.bf16.msrb.mxu3 %v2043_v20 }
  0x8d   :  { %800 = vmatpush.bf16.msrb.mxu2 %v1743_v32 }
  0x8f   :  { %773 = vmatpush.bf16.msrb.mxu0 %v2044_v61  ;;  %786 = vmatpush.bf16.msrb.mxu1 %v1725_v62 }
  0x90   :  { %812 = vmatpush.bf16.msrb.mxu3 %v1731_v54  ;;  %801 = vmatmul.bf16.vlgmr.msrb.gmra.mxu2 %v1812_v4 }
  0x91   :  { %845 = vmatpush.bf16.msra.mxu2 %v1550_v3  ;;  %v2047_v3 = vld [vmem:[#allocation23_spill] sm:$0xff] }
  0x93   :  { %774 = vmatpush.bf16.msrb.mxu0 %v2045_v63  ;;  %787 = vmatpush.bf16.msrb.mxu1 %v1739_v50 }
  0x94   :  { %813 = vmatpush.bf16.msrb.mxu3 %v1745_v30  ;;  %v2048_v30 = vld [vmem:[#allocation25_spill] sm:$0xff] }
  0x95   :  { %846 = vmatpush.bf16.msra.mxu2 %v1561_v16  ;;  %v2050_v16 = vld [vmem:[#allocation32_spill] sm:$0xff] }
  0x96   :  { %775 = vmatmul.bf16.vlgmr.msrb.gmra.mxu0 %v722_v22  ;;  %788 = vmatmul.bf16.vlgmr.msrb.gmra.mxu1 %v1799_v36 }
  0x97   :  { %819 = vmatpush.bf16.msra.mxu0 %v2046_v39  ;;  %832 = vmatpush.bf16.msra.mxu1 %v1758_v11 }
  0x98   :  { %858 = vmatpush.bf16.msra.mxu3 %v1552_v7  ;;  %v2049_v7 = vld [vmem:[#allocation28_spill] sm:$0xff] }
  0x99   :  { %814 = vmatmul.bf16.vlgmr.msrb.gmra.mxu3 %v722_v22  ;;  %847 = vmatpush.bf16.msra.mxu2 %v1571_v29  ;;  %v196_v29 = vld.sshfl [vmem:[#allocation1] sm:$0xff pattern:$0x75316420] }
  0x9b   :  { %820 = vmatpush.bf16.msra.mxu0 %v2047_v3  ;;  %833 = vmatpush.bf16.msra.mxu1 %v1763_v24 }
  0x9c   :  { %859 = vmatpush.bf16.msra.mxu3 %v1563_v17  ;;  %v2051_v17 = vld [vmem:[#allocation36_spill] sm:$0xff] }
  0x9d   :  { %848 = vmatpush.bf16.msra.mxu2 %v1583_v44  ;;  %v2052_v44 = vld [vmem:[#allocation38_spill] sm:$0xff] }
  0x9f   :  { %821 = vmatpush.bf16.msra.mxu0 %v2048_v30  ;;  %834 = vmatpush.bf16.msra.mxu1 %v1769_v13 }
  0xa0   :  { %860 = vmatpush.bf16.msra.mxu3 %v1575_v33  ;;  %v197_v33 = vld.sshfl [vmem:[#allocation1 + $0x8] sm:$0xff pattern:$0x75316420] }
  0xa1   :  { %849 = vmatpush.bf16.msra.mxu2 %v1595_v56  ;;  %v1888_v56 = vpack.c.bf16 %v197_v33, %v197_v33 }
  0xa3   :  { %822 = vmatpush.bf16.msra.mxu0 %v2049_v7  ;;  %835 = vmatpush.bf16.msra.mxu1 %v1775_v26 }
  0xa4   :  { %861 = vmatpush.bf16.msra.mxu3 %v1587_v45  ;;  %v1884_v45 = vpack.c.bf16 %v196_v29, %v196_v29 }
  0xa5   :  { %850 = vmatpush.bf16.msra.mxu2 %v1607_v5 }
  0xa7   :  { %823 = vmatpush.bf16.msra.mxu0 %v2050_v16  ;;  %836 = vmatpush.bf16.msra.mxu1 %v1781_v0 }
  0xa8   :  { %862 = vmatpush.bf16.msra.mxu3 %v1599_v57 }
  0xa9   :  { %851 = vmatpush.bf16.msra.mxu2 %v1619_v23 }
  0xab   :  { %824 = vmatpush.bf16.msra.mxu0 %v1720_v2  ;;  %837 = vmatpush.bf16.msra.mxu1 %v1788_v49 }
  0xac   :  { %863 = vmatpush.bf16.msra.mxu3 %v1611_v6  ;;  %v2056_v6 = vld [vmem:[#allocation27_spill] sm:$0xff] }
  0xad   :  { %852 = vmatpush.bf16.msra.mxu2 %v1631_v43  ;;  %v2057_v43 = vld [vmem:[#allocation31_spill] sm:$0xff] }
  0xaf   :  { %825 = vmatpush.bf16.msra.mxu0 %v2051_v17  ;;  %838 = vmatpush.bf16.msra.mxu1 %v1795_v41 }
  0xb0   :  { %864 = vmatpush.bf16.msra.mxu3 %v1623_v27  ;;  %853 = vmatmul.bf16.vlgmr.msra.gmra.mxu2 %v1884_v45 }
  0xb1   :  { %897 = vmatpush.bf16.msrb.mxu2 %v1642_v59 }
  0xb3   :  { %826 = vmatpush.bf16.msra.mxu0 %v2052_v44  ;;  %839 = vmatpush.bf16.msra.mxu1 %v1803_v31 }
  0xb4   :  { %865 = vmatpush.bf16.msra.mxu3 %v1635_v51 }
  0xb5   :  { %898 = vmatpush.bf16.msrb.mxu2 %v1655_v18  ;;  %v2058_v18 = vld [vmem:[#allocation37_spill] sm:$0xff] }
  0xb6   :  { %827 = vmatmul.bf16.vlgmr.msra.gmra.mxu0 %v1799_v36  ;;  %840 = vmatmul.bf16.vlgmr.msra.gmra.mxu1 %v1812_v4 }
  0xb7   :  { %871 = vmatpush.bf16.msrb.mxu0 %v1554_v8  ;;  %884 = vmatpush.bf16.msrb.mxu1 %v1557_v12  ;;  %v198_v8 = vld.sshfl [vmem:[#allocation1 + $0x10] sm:$0xff pattern:$0x75316420] }
  0xb8   :  { %910 = vmatpush.bf16.msrb.mxu3 %v1644_v60  ;;  %v204_v12 = vpack.c.bf16 %v198_v8, %v198_v8 }
  0xb9   :  { %866 = vmatmul.bf16.vlgmr.msra.gmra.mxu3 %v1888_v56  ;;  %899 = vmatpush.bf16.msrb.mxu2 %v1667_v40 }
  0xbb   :  { %872 = vmatpush.bf16.msrb.mxu0 %v1566_v21  ;;  %885 = vmatpush.bf16.msrb.mxu1 %v1568_v25  ;;  %v2053_v21 = vld [vmem:[#allocation20_spill] sm:$0xff]  ;;  %v2054_v25 = vld [vmem:[#allocation22_spill] sm:$0xff] }
  0xbc   :  { %911 = vmatpush.bf16.msrb.mxu3 %v1659_v19 }
  0xbd   :  { %900 = vmatpush.bf16.msrb.mxu2 %v2035_v10 }
  0xbf   :  { %873 = vmatpush.bf16.msrb.mxu0 %v1577_v34  ;;  %886 = vmatpush.bf16.msrb.mxu1 %v1580_v38 }
  0xc0   :  { %912 = vmatpush.bf16.msrb.mxu3 %v1671_v47 }
  0xc1   :  { %901 = vmatpush.bf16.msrb.mxu2 %v2039_v42 }
  0xc3   :  { %874 = vmatpush.bf16.msrb.mxu0 %v1589_v46  ;;  %887 = vmatpush.bf16.msrb.mxu1 %v2034_v37 }
  0xc4   :  { %913 = vmatpush.bf16.msrb.mxu3 %v1686_v15 }
  0xc5   :  { %902 = vmatpush.bf16.msrb.mxu2 %v2042_v48 }
  0xc7   :  { %875 = vmatpush.bf16.msrb.mxu0 %v1601_v58  ;;  %888 = vmatpush.bf16.msrb.mxu1 %v2038_v35  ;;  %v2055_v58 = vld [vmem:[#allocation24_spill] sm:$0xff] }
  0xc8   :  { %914 = vmatpush.bf16.msrb.mxu3 %v2033_v55 }
  0xc9   :  { %903 = vmatpush.bf16.msrb.mxu2 %v1725_v62 }
  0xcb   :  { %876 = vmatpush.bf16.msrb.mxu0 %v1613_v9  ;;  %889 = vmatpush.bf16.msrb.mxu1 %v2041_v53 }
  0xcc   :  { %915 = vmatpush.bf16.msrb.mxu3 %v2037_v1 }
  0xcd   :  { %904 = vmatpush.bf16.msrb.mxu2 %v1739_v50 }
  0xcf   :  { %877 = vmatpush.bf16.msrb.mxu0 %v1625_v28  ;;  %890 = vmatpush.bf16.msrb.mxu1 %v2044_v61  ;;  %v635_v57 = vpop.f32.mrf.mxu2 }
  0xd0   :  { %916 = vmatpush.bf16.msrb.mxu3 %v1729_v14  ;;  %905 = vmatmul.bf16.vlgmr.msrb.gmra.mxu2 %v1888_v56 }
  0xd1   :  { %949 = vmatpush.bf16.msra.mxu2 %v1758_v11 }
  0xd2   :  { %v609_v34 = vpop.f32.mrf.mxu0 }
  0xd3   :  { %878 = vmatpush.bf16.msrb.mxu0 %v1637_v52  ;;  %891 = vmatpush.bf16.msrb.mxu1 %v2045_v63  ;;  %v622_v38 = vpop.f32.mrf.mxu1 }
  0xd4   :  { %917 = vmatpush.bf16.msrb.mxu3 %v1743_v32  ;;  %v623_v46 = vadd.f32 %v622_v38, %v609_v34 }
  0xd5   :  { %950 = vmatpush.bf16.msra.mxu2 %v1763_v24 }
  0xd6   :  { %879 = vmatmul.bf16.vlgmr.msrb.gmra.mxu0 %v204_v12  ;;  %892 = vmatmul.bf16.vlgmr.msrb.gmra.mxu1 %v1884_v45  ;;  %v636_v5 = vadd.f32 %v635_v57, %v623_v46 }
  0xd7   :  { %923 = vmatpush.bf16.msra.mxu0 %v2053_v21  ;;  %936 = vmatpush.bf16.msra.mxu1 %v2046_v39  ;;  %v637_v28 = vpop.f32.mrf.mxu2 }
  0xd8   :  { %918 = vmatmul.bf16.vlgmr.msrb.gmra.mxu3 %v204_v12 }
  0xd9   :  { %951 = vmatpush.bf16.msra.mxu2 %v1769_v13  ;;  %v648_v9 = vpop.f32.mrf.mxu3 }
  0xda   :  { %v611_v23 = vpop.f32.mrf.mxu0 }
  0xdb   :  { %924 = vmatpush.bf16.msra.mxu0 %v2054_v25  ;;  %937 = vmatpush.bf16.msra.mxu1 %v2047_v3  ;;  %v624_v27 = vpop.f32.mrf.mxu1 }
  0xdd   :  { %952 = vmatpush.bf16.msra.mxu2 %v1775_v26 }
  0xdf   :  { %925 = vmatpush.bf16.msra.mxu0 %v2055_v58  ;;  %938 = vmatpush.bf16.msra.mxu1 %v2048_v30  ;;  %v687_v59 = vpop.f32.mrf.mxu2 }
  0xe1   :  { %953 = vmatpush.bf16.msra.mxu2 %v1781_v0  ;;  %v650_v51 = vpop.f32.mrf.mxu3 }
  0xe2   :  { %v661_v60 = vpop.f32.mrf.mxu0 }
  0xe3   :  { %926 = vmatpush.bf16.msra.mxu0 %v2056_v6  ;;  %939 = vmatpush.bf16.msra.mxu1 %v2049_v7  ;;  %v674_v52 = vpop.f32.mrf.mxu1  ;;  %v662_v61 = vadd.f32 %v661_v60, %v648_v9 }
  0xe5   :  { %954 = vmatpush.bf16.msra.mxu2 %v1788_v49  ;;  %v675_v19 = vadd.f32 %v674_v52, %v662_v61 }
  0xe7   :  { %927 = vmatpush.bf16.msra.mxu0 %v2057_v43  ;;  %940 = vmatpush.bf16.msra.mxu1 %v2050_v16  ;;  %v689_v47 = vpop.f32.mrf.mxu2 }
  0xe9   :  { %955 = vmatpush.bf16.msra.mxu2 %v1795_v41 }
  0xea   :  { %v663_v48 = vpop.f32.mrf.mxu0 }
  0xeb   :  { %928 = vmatpush.bf16.msra.mxu0 %v2043_v20  ;;  %941 = vmatpush.bf16.msra.mxu1 %v1720_v2  ;;  %v700_v2 = vpop.f32.mrf.mxu3  ;;  %v676_v20 = vpop.f32.mrf.mxu1 }
  0xec   :  { %v701_v40 = vadd.f32 %v700_v2, %v687_v59 }
  0xed   :  { %956 = vmatpush.bf16.msra.mxu2 %v1803_v31 }
  0xef   :  { %929 = vmatpush.bf16.msra.mxu0 %v1731_v54  ;;  %942 = vmatpush.bf16.msra.mxu1 %v2051_v17 }
  0xf0   :  { %957 = vmatmul.bf16.vlgmr.msra.gmra.mxu2 %v204_v12 }
  0xf3   :  { %930 = vmatpush.bf16.msra.mxu0 %v2058_v18  ;;  %943 = vmatpush.bf16.msra.mxu1 %v2052_v44  ;;  %v702_v15 = vpop.f32.mrf.mxu3  ;;  %v737_v62 = vpop.f32.mrf.mxu1 }
  0xf4   :  { %v750_v14 = vpop.f32.mrf.mxu2  ;;  %v738_v54 = vadd.f32 %v737_v62, %v636_v5  ;;  %v713_v50 = vpop.f32.mrf.mxu0 }
  0xf5   :  { %v714_v30 = vadd.f32 %v713_v50, %v701_v40 }
  0xf6   :  { %931 = vmatmul.bf16.vlgmr.msra.gmra.mxu0 %v1884_v45  ;;  %944 = vmatmul.bf16.vlgmr.msra.gmra.mxu1 %v1888_v56  ;;  %v751_v32 = vadd.f32 %v750_v14, %v738_v54 }
  0xfb   :  { %v739_v13 = vpop.f32.mrf.mxu1 }
  0xfc   :  { %v763_v11 = vpop.f32.mrf.mxu3  ;;  %v752_v26 = vpop.f32.mrf.mxu2 }
  0xfd   :  { %v764_v24 = vadd.f32 %v763_v11, %v751_v32  ;;  %v715_v0 = vpop.f32.mrf.mxu0 }
 0x104   :  { %v765_v49 = vpop.f32.mrf.mxu3 }
 0x113   :  { %v776_v41 = vpop.f32.mrf.mxu0  ;;  %v789_v36 = vpop.f32.mrf.mxu1 }
 0x114   :  { %v777_v31 = vadd.f32 %v776_v41, %v675_v19  ;;  %v802_v22 = vpop.f32.mrf.mxu2 }
 0x116   :  { %v790_v4 = vadd.f32 %v789_v36, %v777_v31 }
 0x118   :  { %v803_v55 = vadd.f32 %v802_v22, %v790_v4 }
 0x11b   :  { %v778_v39 = vpop.f32.mrf.mxu0  ;;  %v791_v1 = vpop.f32.mrf.mxu1 }
 0x11c   :  { %v815_v37 = vpop.f32.mrf.mxu3  ;;  %v804_v35 = vpop.f32.mrf.mxu2 }
 0x11d   :  { %v816_v10 = vadd.f32 %v815_v37, %v714_v30 }
 0x124   :  { %v817_v42 = vpop.f32.mrf.mxu3 }
 0x133   :  { %v828_v63 = vpop.f32.mrf.mxu0  ;;  %v841_v53 = vpop.f32.mrf.mxu1 }
 0x134   :  { %v854_v3 = vpop.f32.mrf.mxu2  ;;  %v829_v27 = vadd.f32 %v828_v63, %v816_v10 }
 0x136   :  { %v842_v51 = vadd.f32 %v841_v53, %v829_v27 }
 0x13b   :  { %v830_v7 = vpop.f32.mrf.mxu0  ;;  %v843_v17 = vpop.f32.mrf.mxu1 }
 0x13c   :  { %v867_v16 = vpop.f32.mrf.mxu3  ;;  %v856_v29 = vpop.f32.mrf.mxu2 }
 0x13d   :  { %v868_v44 = vadd.f32 %v867_v16, %v854_v3 }
 0x144   :  { %v869_v33 = vpop.f32.mrf.mxu3 }
 0x153   :  { %v880_v45 = vpop.f32.mrf.mxu0  ;;  %v893_v8 = vpop.f32.mrf.mxu1 }
 0x154   :  { %v881_v56 = vadd.f32 %v880_v45, %v868_v44  ;;  %v906_v21 = vpop.f32.mrf.mxu2 }
 0x155   :  { %v907_v25 = vadd.f32 %v906_v21, %v893_v8 }
 0x156   :  { %v962_v12 = vadd.f32 %v881_v56, %v764_v24 }
 0x158   :  { %965 = vst [vmem:[#allocation7] sm:$0xf] %v962_v12 }
 0x159   :  { %978 = dma.vmem_to_hbm [thread:$0]  %s974_s1, 64, %s976_s29, [#allocation4]  }
 0x15b   :  { %v919_v34 = vpop.f32.mrf.mxu3  ;;  %v882_v38 = vpop.f32.mrf.mxu0 }
 0x15c   :  { %v920_v46 = vadd.f32 %v919_v34, %v907_v25  ;;  %v895_v57 = vpop.f32.mrf.mxu1  ;;  %v908_v5 = vpop.f32.mrf.mxu2 }
 0x15e   :  { %v963_v58 = vadd.f32 %v920_v46, %v803_v55 }
 0x160   :  { %966 = vst [vmem:[#allocation8] sm:$0xf] %v963_v58 }
 0x161   :  { %989 = dma.vmem_to_hbm [thread:$0]  %s985_s5, 64, %s987_s8, [#allocation9]  }
 0x163   :  { %v921_v6 = vpop.f32.mrf.mxu3 }
 0x173   :  { %v932_v9 = vpop.f32.mrf.mxu0  ;;  %v945_v23 = vpop.f32.mrf.mxu1 }
 0x174   :  { %v946_v28 = vadd.f32 %v945_v23, %v932_v9  ;;  %v958_v43 = vpop.f32.mrf.mxu2 }
 0x176   :  { %v959_v52 = vadd.f32 %v958_v43, %v946_v28 }
 0x178   :  { %v964_v59 = vadd.f32 %v959_v52, %v842_v51 }
 0x17a   :  { %967 = vst [vmem:[#allocation10] sm:$0xf] %v964_v59 }
 0x17b   :  { %v934_v60 = vpop.f32.mrf.mxu0  ;;  %v947_v61 = vpop.f32.mrf.mxu1  ;;  %1000 = dma.vmem_to_hbm [thread:$0]  %s996_s9, 64, %s998_s3, [#allocation9]  }
 0x17c   :  { %v960_v18 = vpop.f32.mrf.mxu2 }
 0x17d   :  { %1508 = dma.done.wait [#allocation4], 64  }
 0x17e   :  { %1509 = vsyncadd [#allocation4], 4294967232 }
 0x17f   :  { %1510 = dma.done.wait [#allocation9], 128  }
 0x180   :  { %1511 = vsyncadd [#allocation9], 4294967168 }
 0x181   :  { %1013 = vsyncpa [#allocation3], 1 }
 0x182   :  { %1014 = vsyncpa [#allocation6], 1 }
 0x183   :  { %1015 = vsyncpa [#allocation4], 1 }
 0x184   :  { %1016 = vsyncpa [#allocation9], 1 }

</bundles_post_ra>
